<compile_context>
chip_gen: v5e
topology: v5e:2x2
jax: 0.10.0
libtpu: 0.0.40
codegen_flags: <defaults>
</compile_context>

<pallas_src>
import functools

import jax
import jax.numpy as jnp
from jax.experimental import pallas as pl
from jax.experimental.pallas import tpu as pltpu


# --------------------------------------------------------------------------- #
# Kernel
# --------------------------------------------------------------------------- #
def _bahdanau_kernel(enc_ref,    # [tS, tB, H] VMEM  encoder-outputs block
                     hproj_ref,  # [tB, H]     VMEM  W2(combined hidden) + b1 + b2
                     mask_ref,   # [S_pad, tB] VMEM  1.0 keep / 0.0 pad (resident per batch tile)
                     w1_ref,     # [H, H]      VMEM  W1 weight (x @ w1), resident, matmul dtype
                     v_ref,      # [1, H]      VMEM  V weight as a lane row, resident
                     out_ref,    # [S_pad, tB] VMEM  scores -> attention weights (accumulator)
                     *, matmul_dtype):
    s = pl.program_id(1)
    tS, tB, H = enc_ref.shape

    # --- W1 @ encoder block on the MXU (rows = tS*tB, f32 accumulation) ---
    enc2 = enc_ref[...].reshape(tS * tB, H)
    if enc2.dtype != jnp.dtype(matmul_dtype):
        enc2 = enc2.astype(matmul_dtype)
    w1e = jnp.dot(enc2, w1_ref[...], preferred_element_type=jnp.float32)      # [tS*tB, H]

    # --- add W2(combined)+b1+b2 (broadcast over tS) and tanh on the EUP ---
    # TODO(synk): on v6e/v7x the tanh could run in bf16 (~2x EUP); kept f32 (v5e-safe).
    t = jnp.tanh(w1e.reshape(tS, tB, H) + hproj_ref[...][None, :, :])         # [tS, tB, H]

    # --- V projection: VPU multiply + lane reduce over H (no width-1 MXU matmul).
    #     V bias omitted: softmax over the sequence axis is shift-invariant.  ---
    sc = jnp.sum(t * v_ref[...][None, :, :], axis=-1)                         # [tS, tB]

    # --- stash raw scores of this sequence tile in the resident output block ---
    row = s * tS
    if tS % 8 == 0:
        row = pl.multiple_of(row, 8)
    out_ref[pl.ds(row, tS), :] = sc

    # --- masked softmax over the sequence axis, once, at the last sequence step ---
    @pl.when(s == pl.num_programs(1) - 1)
    def _():
        scores = jnp.where(mask_ref[...] > 0.0, out_ref[...], jnp.float32(-1e18))
        m = jnp.max(scores, axis=0, keepdims=True)
        e = jnp.exp(scores - m)
        out_ref[...] = e * pl.reciprocal(jnp.sum(e, axis=0, keepdims=True), approx=True)


# --------------------------------------------------------------------------- #
# Tile / VMEM heuristics
# --------------------------------------------------------------------------- #
def _round_up(x, m):
    return ((x + m - 1) // m) * m


def _vmem_budget_bytes():
    """Generation-aware VMEM budget (fallback assumes v7x's 64 MiB)."""
    cap = None
    try:
        cap = getattr(pltpu.get_tpu_info(), "vmem_capacity_bytes", None)
    except Exception:
        cap = None
    if not cap:
        cap = 64 * 1024 * 1024
    return int(cap) * 3 // 4


def _pick_tiles(B, S, H, enc_itemsize, budget):
    # Batch tile: multiple of 8 (sublane rule, free reshape); keep >= 2 tiles
    # when B allows so the "parallel" axis feeds both v7x TensorCores.
    if B <= 8:
        tB = B
    elif B < 16:
        tB = 8
    else:
        tB = max(8, min(64, ((B // 2) // 8) * 8))
    # Sequence tile: multiple of 8, sized so the double-buffered encoder blocks
    # plus f32 intermediates fit the budget, capped so the pipeline has depth.
    slab = _round_up(S, 8) * 128 * 4                       # lane-padded (S_pad, tB) slab
    fixed = 4 * slab + 2 * H * H * 4 + 4 * tB * H * 4 + (4 << 20)
    per_ts = tB * H * (2 * enc_itemsize + 3 * 4)
    tS = (max(0, int(budget * 0.85) - fixed)) // max(1, per_ts)
    tS = int(max(8, min(tS, 512)))
    tS = max(8, (tS // 8) * 8)
    if tS >= S:
        tS = S
    return tB, tS


# --------------------------------------------------------------------------- #
# Parameters & wrapper
# --------------------------------------------------------------------------- #
def init_params(key, hidden_size, n_layers):
    ks = jax.random.split(key, 8)
    scale = 0.1
    return dict(
        fc_w=jax.random.normal(ks[0], (1, n_layers), jnp.float32) * scale,              # fc.weight
        fc_b=jax.random.normal(ks[1], (1,), jnp.float32) * scale,                       # fc.bias
        w1=jax.random.normal(ks[2], (hidden_size, hidden_size), jnp.float32) * scale,   # W1.weight.T
        b1=jax.random.normal(ks[3], (1, hidden_size), jnp.float32) * scale,
        w2=jax.random.normal(ks[4], (hidden_size, hidden_size), jnp.float32) * scale,   # W2.weight.T
        b2=jax.random.normal(ks[5], (1, hidden_size), jnp.float32) * scale,
        v=jax.random.normal(ks[6], (hidden_size, 1), jnp.float32) * scale,              # V.weight.T
        vb=jax.random.normal(ks[7], (1,), jnp.float32) * scale,
    )


def bahdanau_attention(params, hidden_state, encoder_outputs, sequence_mask=None, *,
                       matmul_dtype=jnp.bfloat16, batch_tile=None, seq_tile=None):
    """hidden_state [L,B,H], encoder_outputs [S,B,H], sequence_mask [S,B,1] -> [S,B,1]."""
    L, B, H = hidden_state.shape
    S = encoder_outputs.shape[0]
    if hidden_state.shape[-1] != encoder_outputs.shape[-1]:
        raise ValueError("Hidden size does not match in encoder_outputs and hidden_state.")

    # ---- tiny prologue hoisted out of the hot kernel (O(L*B*H + B*H^2)) ----
    if L > 1:
        combined = jnp.einsum("lbh,l->bh", hidden_state, params["fc_w"][0]) + params["fc_b"][0]
    else:
        combined = hidden_state[0]                                              # [B, H]
    # W2(combined) with both linear biases folded in (added once before tanh).
    hproj = (combined @ params["w2"] + (params["b1"][0] + params["b2"][0])).astype(jnp.float32)

    # ---- tiles & padding ----
    budget = _vmem_budget_bytes()
    enc_item = jnp.dtype(encoder_outputs.dtype).itemsize
    tB_auto, tS_auto = _pick_tiles(B, S, H, enc_item, budget)
    tB = batch_tile if batch_tile is not None else tB_auto
    tS = seq_tile if seq_tile is not None else tS_auto
    nb, ns = pl.cdiv(B, tB), pl.cdiv(S, tS)
    S_pad, B_pad = ns * tS, nb * tB

    # ---- pack the (tiny) mask as (nb, S_pad, tB); padded rows/cols are masked out ----
    if sequence_mask is None:
        m2 = jnp.ones((S, B), jnp.float32)
    else:
        m2 = sequence_mask.reshape(S, B).astype(jnp.float32)
    m2 = jnp.pad(m2, ((0, S_pad - S), (0, B_pad - B)))
    mask3 = m2.reshape(S_pad, nb, tB).transpose(1, 0, 2)                        # [nb, S_pad, tB]

    w1 = params["w1"].astype(matmul_dtype)          # pre-cast once (VMEM-resident in kernel)
    v_row = params["v"].reshape(1, H).astype(jnp.float32)

    grid = (nb, ns)
    in_specs = [
        pl.BlockSpec((tS, tB, H), lambda i, s: (s, i, 0)),        # encoder block (pipelined)
        pl.BlockSpec((tB, H), lambda i, s: (i, 0)),               # hproj block
        pl.BlockSpec((None, S_pad, tB), lambda i, s: (i, 0, 0)),  # mask slab (resident / batch tile)
        pl.BlockSpec((H, H), lambda i, s: (0, 0)),                # W1 (VMEM-resident)
        pl.BlockSpec((1, H), lambda i, s: (0, 0)),                # V row (VMEM-resident)
    ]
    out_spec = pl.BlockSpec((None, S_pad, tB), lambda i, s: (i, 0, 0))  # accumulator over s

    cost = pl.CostEstimate(
        flops=2 * S * B * H * H + 6 * S * B * H + 6 * S * B,
        transcendentals=S * B * H + S * B,
        bytes_accessed=S * B * H * enc_item + 4 * (B * H + H * H + H + 2 * S_pad * B_pad),
    )

    kernel = functools.partial(_bahdanau_kernel, matmul_dtype=matmul_dtype)
    out3 = pl.pallas_call(
        kernel,
        out_shape=jax.ShapeDtypeStruct((nb, S_pad, tB), jnp.float32),
        grid=grid,
        in_specs=in_specs,
        out_specs=out_spec,
        compiler_params=pltpu.CompilerParams(
            dimension_semantics=("parallel", "arbitrary"),        # batch tiles independent, S reduced
            vmem_limit_bytes=budget,
        ),
        cost_estimate=cost,
    )(encoder_outputs, hproj, mask3, w1, v_row)

    # ---- unpack the tiny result back to the PyTorch layout [S, B, 1] ----
    out = out3.transpose(1, 0, 2).reshape(S_pad, B_pad)[:S, :B]
    return out[:, :, None]


def bahdanau_reference(params, hidden_state, encoder_outputs, sequence_mask, n_layers):
    """Pure-JAX mirror of the PyTorch forward (for correctness check)."""
    if n_layers > 1:
        hs = jnp.transpose(hidden_state, (1, 2, 0))                     # [B, H, L]
        hs = hs @ params["fc_w"].T + params["fc_b"]                     # [B, H, 1]
        combined = jnp.transpose(hs, (2, 0, 1))                         # [1, B, H]
    else:
        combined = hidden_state
    w1e = encoder_outputs @ params["w1"] + params["b1"][0]              # [S, B, H]
    w2h = combined @ params["w2"] + params["b2"][0]                     # [1, B, H]
    scores = jnp.tanh(w1e + w2h) @ params["v"] + params["vb"]           # [S, B, 1]
    if sequence_mask is not None:
        scores = jnp.where(sequence_mask, scores, jnp.float32(-1e18))
    return jax.nn.softmax(scores, axis=0)


# --------------------------------------------------------------------------- #
# Demo / self-test
# --------------------------------------------------------------------------- #
if __name__ == "__main__":
    H, L = 32, 2
    key = jax.random.PRNGKey(0)
    kp, kh, ke = jax.random.split(key, 3)
    params = init_params(kp, H, L)

    # --- small case (single tile) ---
    B, S = 2, 8
    hidden_state = jax.random.normal(kh, (L, B, H), jnp.float32)        # [n_layers, batch, hidden]
    encoder_outputs = jax.random.normal(ke, (S, B, H), jnp.float32)     # [seq, batch, hidden]
    lengths = jnp.array([S, S - 3])
    sequence_mask = (jnp.arange(S)[:, None] < lengths[None, :])[..., None]   # [S, B, 1] bool

    ref = bahdanau_reference(params, hidden_state, encoder_outputs, sequence_mask, L)

    # f32 MXU-operand path (tight check; approx reciprocal -> ~1e-4 rel error).
    attn = bahdanau_attention(params, hidden_state, encoder_outputs, sequence_mask,
                              matmul_dtype=jnp.float32)
    attn = jax.block_until_ready(attn)
    assert attn.shape == (S, B, 1)
    assert jnp.allclose(attn, ref, atol=5e-3, rtol=5e-3), float(jnp.max(jnp.abs(attn - ref)))

    # Default bf16 MXU-operand path (f32 accumulation) — looser tolerance.
    attn_bf = jax.block_until_ready(
        bahdanau_attention(params, hidden_state, encoder_outputs, sequence_mask))
    assert jnp.allclose(attn_bf, ref, atol=2e-2, rtol=2e-2), float(jnp.max(jnp.abs(attn_bf - ref)))

    # No-mask path.
    attn_nm = jax.block_until_ready(
        bahdanau_attention(params, hidden_state, encoder_outputs, None, matmul_dtype=jnp.float32))
    ref_nm = bahdanau_reference(params, hidden_state, encoder_outputs, None, L)
    assert jnp.allclose(attn_nm, ref_nm, atol=5e-3, rtol=5e-3)

    # --- multi-tile case: 2 batch tiles (last partial) x 3 sequence tiles (last partial) ---
    B2, S2 = 12, 40
    h2 = jax.random.normal(kh, (L, B2, H), jnp.float32)
    e2 = jax.random.normal(ke, (S2, B2, H), jnp.float32)
    len2 = jnp.arange(B2) % S2 + 1
    m2 = (jnp.arange(S2)[:, None] < len2[None, :])[..., None]
    ref2 = bahdanau_reference(params, h2, e2, m2, L)
    attn2 = bahdanau_attention(params, h2, e2, m2, matmul_dtype=jnp.float32,
                               batch_tile=8, seq_tile=16)
    attn2 = jax.block_until_ready(attn2)
    assert attn2.shape == (S2, B2, 1)
    assert jnp.allclose(attn2, ref2, atol=5e-3, rtol=5e-3), float(jnp.max(jnp.abs(attn2 - ref2)))

    print("KERNEL_OK")
</pallas_src>

<mosaic_0001>
module attributes {stable_mosaic.version = 11 : i64} {
  func.func @_bahdanau_kernel(%arg0: i32, %arg1: i32, %arg2: memref<8x2x32xf32, #tpu.memory_space<vmem>>, %arg3: memref<2x32xf32, #tpu.memory_space<vmem>>, %arg4: memref<1x8x2xf32, #tpu.memory_space<vmem>>, %arg5: memref<32x32xf32, #tpu.memory_space<vmem>>, %arg6: memref<1x32xf32, #tpu.memory_space<vmem>>, %arg7: memref<1x8x2xf32, #tpu.memory_space<vmem>>) attributes {dimension_semantics = [#tpu.dimension_semantics<parallel>, #tpu.dimension_semantics<arbitrary>], iteration_bounds = array<i64: 1, 1>, scalar_prefetch = 0 : i64, scratch_operands = 0 : i64, tpu.core_type = #tpu.core_type<tc>, window_params = [{transform_indices = @transform_0, window_bounds = array<i64: 8, 2, 32>}, {transform_indices = @transform_1, window_bounds = array<i64: 2, 32>}, {transform_indices = @transform_2, window_bounds = array<i64: 1, 8, 2>}, {pipeline_mode = #tpu.pipeline_mode<synchronous>, transform_indices = @transform_3, window_bounds = array<i64: 32, 32>}, {pipeline_mode = #tpu.pipeline_mode<synchronous>, transform_indices = @transform_4, window_bounds = array<i64: 1, 32>}, {transform_indices = @transform_5, window_bounds = array<i64: 1, 8, 2>}]} {
    %c0 = arith.constant 0 : index
    %c0_0 = arith.constant 0 : index
    %c0_1 = arith.constant 0 : index
    %0 = vector.load %arg2[%c0, %c0_0, %c0_1] : memref<8x2x32xf32, #tpu.memory_space<vmem>>, vector<8x2x32xf32>
    %1 = vector.shape_cast %0 : vector<8x2x32xf32> to vector<16x32xf32>
    %c0_2 = arith.constant 0 : index
    %c0_3 = arith.constant 0 : index
    %2 = vector.load %arg5[%c0_2, %c0_3] : memref<32x32xf32, #tpu.memory_space<vmem>>, vector<32x32xf32>
    %cst = arith.constant dense<0.000000e+00> : vector<16x32xf32>
    %3 = tpu.matmul %1, %2, %cst {dimension_numbers = #tpu.dot_dimension_numbers<[1], [0], [0], [1], [0, 0, 1, 1], [], []>} : vector<16x32xf32>, vector<32x32xf32>, vector<16x32xf32> -> vector<16x32xf32>
    %4 = vector.shape_cast %3 : vector<16x32xf32> to vector<8x2x32xf32>
    %c0_4 = arith.constant 0 : index
    %c0_5 = arith.constant 0 : index
    %5 = vector.load %arg3[%c0_4, %c0_5] : memref<2x32xf32, #tpu.memory_space<vmem>>, vector<2x32xf32>
    %6 = vector.shape_cast %5 : vector<2x32xf32> to vector<1x2x32xf32>
    %7 = vector.broadcast %6 : vector<1x2x32xf32> to vector<8x2x32xf32>
    %8 = arith.addf %4, %7 : vector<8x2x32xf32>
    %9 = math.tanh %8 : vector<8x2x32xf32>
    %c0_6 = arith.constant 0 : index
    %c0_7 = arith.constant 0 : index
    %10 = vector.load %arg6[%c0_6, %c0_7] : memref<1x32xf32, #tpu.memory_space<vmem>>, vector<1x32xf32>
    %11 = vector.shape_cast %10 : vector<1x32xf32> to vector<1x1x32xf32>
    %12 = vector.broadcast %11 : vector<1x1x32xf32> to vector<8x2x32xf32>
    %13 = arith.mulf %9, %12 : vector<8x2x32xf32>
    %cst_8 = arith.constant dense<0.000000e+00> : vector<8x2xf32>
    %14 = vector.multi_reduction <add>, %13, %cst_8 [2] : vector<8x2x32xf32> to vector<8x2xf32>
    %c8_i32 = arith.constant 8 : i32
    %15 = arith.muli %arg1, %c8_i32 : i32
    %16 = tpu.assume_multiple %15, 8 : i32
    %c0_9 = arith.constant 0 : index
    %17 = arith.index_cast %16 : i32 to index
    %c0_10 = arith.constant 0 : index
    %18 = vector.load %arg7[%c0_9, %17, %c0_10] : memref<1x8x2xf32, #tpu.memory_space<vmem>>, vector<1x8x2xf32>
    %19 = vector.shape_cast %18 : vector<1x8x2xf32> to vector<8x2xf32>
    %20 = vector.shape_cast %14 : vector<8x2xf32> to vector<1x8x2xf32>
    tpu.vector_store %arg7[%c0_9, %17, %c0_10], %20 {strides = array<i32>} : memref<1x8x2xf32, #tpu.memory_space<vmem>>, vector<1x8x2xf32>,
    %c0_i32 = arith.constant 0 : i32
    %21 = arith.cmpi eq, %arg1, %c0_i32 : i32
    %22 = arith.extui %21 : i1 to i32
    %c0_i32_11 = arith.constant 0 : i32
    %23 = arith.cmpi ne, %22, %c0_i32_11 : i32
    scf.if %23 {
      %c0_12 = arith.constant 0 : index
      %c0_13 = arith.constant 0 : index
      %c0_14 = arith.constant 0 : index
      %24 = vector.load %arg4[%c0_12, %c0_13, %c0_14] : memref<1x8x2xf32, #tpu.memory_space<vmem>>, vector<1x8x2xf32>
      %25 = vector.shape_cast %24 : vector<1x8x2xf32> to vector<8x2xf32>
      %cst_15 = arith.constant 0.000000e+00 : f32
      %26 = vector.broadcast %cst_15 : f32 to vector<8x2xf32>
      %27 = arith.cmpf ogt, %25, %26 : vector<8x2xf32>
      %c0_16 = arith.constant 0 : index
      %c0_17 = arith.constant 0 : index
      %c0_18 = arith.constant 0 : index
      %28 = vector.load %arg7[%c0_16, %c0_17, %c0_18] : memref<1x8x2xf32, #tpu.memory_space<vmem>>, vector<1x8x2xf32>
      %29 = vector.shape_cast %28 : vector<1x8x2xf32> to vector<8x2xf32>
      %cst_19 = arith.constant -9.99999984E+17 : f32
      %30 = vector.broadcast %cst_19 : f32 to vector<8x2xf32>
      %31 = arith.select %27, %29, %30 : vector<8x2xi1>, vector<8x2xf32>
      %cst_20 = arith.constant dense<0xFF800000> : vector<2xf32>
      %32 = vector.multi_reduction <maximumf>, %31, %cst_20 [0] : vector<8x2xf32> to vector<2xf32>
      %33 = vector.shape_cast %32 : vector<2xf32> to vector<1x2xf32>
      %34 = vector.broadcast %33 : vector<1x2xf32> to vector<8x2xf32>
      %35 = arith.subf %31, %34 : vector<8x2xf32>
      %36 = math.exp %35 : vector<8x2xf32>
      %cst_21 = arith.constant dense<0.000000e+00> : vector<2xf32>
      %37 = vector.multi_reduction <add>, %36, %cst_21 [0] : vector<8x2xf32> to vector<2xf32>
      %38 = vector.shape_cast %37 : vector<2xf32> to vector<1x2xf32>
      %39 = tpu.reciprocal %38 {approx = true} : vector<1x2xf32> -> vector<1x2xf32>
      %40 = vector.broadcast %39 : vector<1x2xf32> to vector<8x2xf32>
      %41 = arith.mulf %36, %40 : vector<8x2xf32>
      %c0_22 = arith.constant 0 : index
      %c0_23 = arith.constant 0 : index
      %c0_24 = arith.constant 0 : index
      %42 = vector.load %arg7[%c0_22, %c0_23, %c0_24] : memref<1x8x2xf32, #tpu.memory_space<vmem>>, vector<1x8x2xf32>
      %43 = vector.shape_cast %42 : vector<1x8x2xf32> to vector<8x2xf32>
      %44 = vector.shape_cast %41 : vector<8x2xf32> to vector<1x8x2xf32>
      tpu.vector_store %arg7[%c0_22, %c0_23, %c0_24], %44 {strides = array<i32>} : memref<1x8x2xf32, #tpu.memory_space<vmem>>, vector<1x8x2xf32>,
    } else {
    }
    return
  }
  func.func @transform_0(%arg0: i32, %arg1: i32) -> (i32, i32, i32) {
    %c0_i32 = arith.constant 0 : i32
    %c0_i32_0 = arith.constant 0 : i32
    return %arg1, %arg0, %c0_i32 : i32, i32, i32
  }
  func.func @transform_1(%arg0: i32, %arg1: i32) -> (i32, i32) {
    %c0_i32 = arith.constant 0 : i32
    %c0_i32_0 = arith.constant 0 : i32
    return %arg0, %c0_i32 : i32, i32
  }
  func.func @transform_2(%arg0: i32, %arg1: i32) -> (i32, i32, i32) {
    %c0_i32 = arith.constant 0 : i32
    %c0_i32_0 = arith.constant 0 : i32
    %c0_i32_1 = arith.constant 0 : i32
    return %arg0, %c0_i32, %c0_i32_0 : i32, i32, i32
  }
  func.func @transform_3(%arg0: i32, %arg1: i32) -> (i32, i32) {
    %c0_i32 = arith.constant 0 : i32
    %c0_i32_0 = arith.constant 0 : i32
    %c0_i32_1 = arith.constant 0 : i32
    return %c0_i32, %c0_i32_0 : i32, i32
  }
  func.func @transform_4(%arg0: i32, %arg1: i32) -> (i32, i32) {
    %c0_i32 = arith.constant 0 : i32
    %c0_i32_0 = arith.constant 0 : i32
    %c0_i32_1 = arith.constant 0 : i32
    return %c0_i32, %c0_i32_0 : i32, i32
  }
  func.func @transform_5(%arg0: i32, %arg1: i32) -> (i32, i32, i32) {
    %c0_i32 = arith.constant 0 : i32
    %c0_i32_0 = arith.constant 0 : i32
    %c0_i32_1 = arith.constant 0 : i32
    return %arg0, %c0_i32, %c0_i32_0 : i32, i32, i32
  }
}

</mosaic_0001>

<bundles_post_ra>
// kernel: tpu_custom_call.1
= control target key start
LH: loop header
LB: loop body
LE: loop exit
PB: predicated region body
PF: predicated region fallthrough
CT: control target
= control target key end

     0   :  { %10 = vsyncpa [#allocation3], 0  ;;  %s413_s0 = inlined_call_operand.hbm [shape: f32[8,2,32], index: 0, kind: input, shape index: {}]   ;;  %s414_s1 = inlined_call_operand.vmem [shape: f32[2,32], index: 1, kind: input, shape index: {}]   ;;  %s415_s2 = inlined_call_operand.vmem [shape: f32[1,8,2], index: 2, kind: input, shape index: {}]   ;;  %s416_s3 = inlined_call_operand.hbm [shape: f32[32,32], index: 3, kind: input, shape index: {}]   ;;  %s417_s4 = inlined_call_operand.vmem [shape: f32[1,32], index: 4, kind: input, shape index: {}]   ;;  %s418_s5 = inlined_call_operand.vmem [shape: f32[1,8,2], index: 5, kind: output, shape index: {}]  }
   0x1   :  { %s16_s20 = sshll.u32 %s413_s0, 4  ;;  %s17_s20 = int_to_ptr.hbm [resolvable:$true] %s16_s20 }
   0x2   :  { %11 = vsyncpa [#allocation5], 0  ;;  %s341_s21 = smov [#allocation2]   ;;  %s33_s25 = sshll.u32 %s416_s3, 4  ;;  %s34_s25 = int_to_ptr.hbm [resolvable:$true] %s33_s25 }
   0x3   :  { %s18_s22 = sshll.u32 %s341_s21, 4  ;;  %s342_s26 = smov 32   ;;  %s19_s22 = int_to_ptr.vmem [resolvable:$true] %s18_s22 }
   0x4   :  { %s343_s27 = smov 2   ;;  %s344_s28 = smov [#allocation4]  }
   0x5   :  { %24 = dma.hbm_to_vmem [thread:$0]  %s17_s20, 256, %s19_s22, [#allocation3], %s342_s26, %s342_s26, %s343_s27  }
   0x6   :  { %s35_s29 = sshll.u32 %s344_s28, 4  ;;  %s345_s30 = smov 128   ;;  %s36_s29 = int_to_ptr.vmem [resolvable:$true] %s35_s29 }
   0x7   :  { %s346_s6 = smov 8  }
   0x8   :  { %41 = dma.hbm_to_vmem [thread:$0]  %s34_s25, 512, %s36_s29, [#allocation5], %s345_s30, %s345_s30, %s346_s6  }
   0x9   :  { %337 = dma.done.wait [#allocation3], 256  }
   0xa   :  { %338 = vsyncadd [#allocation3], 4294967040 }
   0xb   :  { %339 = dma.done.wait [#allocation5], 512  }
   0xc   :  { %340 = vsyncadd [#allocation5], 4294966784  ;;  %v63_v0 = vld [vmem:[#allocation4 + $0x18] sm:$0xff]  ;;  %v62_v1 = vld [vmem:[#allocation4 + $0x10] sm:$0xff]  ;;  %vm89_vm0 = vcmask 261120   ;;  %vm160_vm1 = vcmask 254976   ;;  %v194_v57 = vlaneseq }
   0xd   :  { %106 = vmatpush.msra.mxu0 %v63_v0  ;;  %258 = vmatpush.msra.mxu1 %v63_v0  ;;  %v61_v2 = vld [vmem:[#allocation4 + $0x8] sm:$0xff]  ;;  %v52_v3 = vld [vmem:[#allocation2] sm:$0x3]  ;;  %v53_v4 = vld [vmem:[#allocation2 + $0x2] sm:$0x3]  ;;  %vm204_vm2 = vcmask 1041409  }
   0xe   :  { %v54_v5 = vld [vmem:[#allocation2 + $0x4] sm:$0x3]  ;;  %v55_v6 = vld [vmem:[#allocation2 + $0x6] sm:$0x3]  ;;  %72 = vst [vmem:[#allocation1] ss:$4 sm:$0xff] %v52_v3 }
   0xf   :  { %107 = vmatpush.msra.mxu0 %v62_v1  ;;  %259 = vmatpush.msra.mxu1 %v62_v1  ;;  %74 = vst [vmem:[#allocation1 + $0x1] ss:$4 sm:$0xff] %v53_v4  ;;  %v56_v7 = vld [vmem:[#allocation2 + $0x8] sm:$0x3]  ;;  %v60_v8 = vld [vmem:[#allocation4] sm:$0xff]  ;;  %v195_v59 = vand.u32 127, %v194_v57 }
  0x10   :  { %76 = vst [vmem:[#allocation1 + $0x2] ss:$4 sm:$0xff] %v54_v5  ;;  %v57_v9 = vld [vmem:[#allocation2 + $0xa] sm:$0x3]  ;;  %v58_v10 = vld [vmem:[#allocation2 + $0xc] sm:$0x3] }
  0x11   :  { %108 = vmatpush.msra.mxu0 %v61_v2  ;;  %260 = vmatpush.msra.mxu1 %v61_v2  ;;  %78 = vst [vmem:[#allocation1 + $0x3] ss:$4 sm:$0xff] %v55_v6  ;;  %v59_v11 = vld [vmem:[#allocation2 + $0xe] sm:$0x3]  ;;  %v131_v14 = vld [vmem:[%s414_s1] sm:$0x3] }
  0x12   :  { %80 = vst [vmem:[#allocation1 + $0x20] ss:$4 sm:$0xff] %v56_v7  ;;  %v268_v26 = vld [vmem:[%s417_s4] ss:$0 sm:$0xff]  ;;  %vm206_vm3 = vcmask 1042434   ;;  %vm208_vm4 = vcmask 1043459  }
  0x13   :  { %109 = vmatpush.msra.mxu0 %v60_v8  ;;  %261 = vmatpush.msra.mxu1 %v60_v8  ;;  %82 = vst [vmem:[#allocation1 + $0x21] ss:$4 sm:$0xff] %v57_v9  ;;  %vm210_vm5 = vcmask 1044484   ;;  %vm212_vm6 = vcmask 1045509   ;;  %vm214_vm7 = vcmask 1046534   ;;  %vm216_vm8 = vcmask 1047559  }
  0x14   :  { %84 = vst [vmem:[#allocation1 + $0x22] ss:$4 sm:$0xff] %v58_v10  ;;  %vm220_vm9 = vcmask 15360  }
  0x15   :  { %86 = vst [vmem:[#allocation1 + $0x23] ss:$4 sm:$0xff] %v59_v11 }
  0x18   :  { %v87_v12 = vld.sshfl [vmem:[#allocation1] sm:$0xff pattern:$0x73625140] }
  0x19   :  { %256 = vmatmul.msk.f32.vlgmr.msra.gmra.mxu0 %vm89_vm0, %v87_v12 }
  0x1c   :  { %v88_v13 = vld.sshfl [vmem:[#allocation1 + $0x20] sm:$0xff pattern:$0x73625140] }
  0x1d   :  { %257 = vmatmul.msk.f32.vlgmr.msra.gmra.mxu1 %vm89_vm0, %v88_v13 }
  0x96   :  { %v111_v15 = vpop.f32.mrf.mxu0 }
  0x97   :  { %v119_v16 = vrot.slane %v111_v15, 2  ;;  %v120_v17 = vrot.slane %v111_v15, 4  ;;  %v121_v18 = vrot.slane %v111_v15, 6  ;;  %v132_v19 = vadd.f32 %v131_v14, %v111_v15 }
  0x99   :  { %v133_v20 = vadd.f32 %v131_v14, %v119_v16  ;;  %v134_v21 = vadd.f32 %v131_v14, %v120_v17  ;;  %269 = vtanh.f32 %v132_v19  ;;  %v135_v23 = vadd.f32 %v131_v14, %v121_v18  ;;  %v226_v17 = vld [vmem:[%s415_s2] sm:$0xff] }
  0x9a   :  { %v114_v22 = vpop.f32.mrf.mxu1  ;;  %vm227_vm10 = vcmp.gt.f32.partialorder %v226_v17, 0.0 }
  0x9b   :  { %v122_v24 = vrot.slane %v114_v22, 2  ;;  %271 = vtanh.f32 %v134_v21  ;;  %v136_v25 = vadd.f32 %v131_v14, %v114_v22  ;;  %v123_v27 = vrot.slane %v114_v22, 4 }
  0x9c   :  { %273 = vtanh.f32 %v133_v20  ;;  %v124_v30 = vrot.slane %v114_v22, 6 }
  0x9d   :  { %v137_v28 = vadd.f32 %v131_v14, %v122_v24  ;;  %275 = vtanh.f32 %v136_v25  ;;  %v138_v32 = vadd.f32 %v131_v14, %v123_v27 }
  0x9e   :  { %277 = vtanh.f32 %v135_v23  ;;  %v139_v38 = vadd.f32 %v131_v14, %v124_v30 }
  0x9f   :  { %v270_v29 = vpop.eup %269  ;;  %279 = vtanh.f32 %v137_v28 }
  0xa0   :  { %v152_v31 = vmul.f32 %v270_v29, %v268_v26  ;;  %281 = vtanh.f32 %v138_v32 }
  0xa1   :  { %v272_v33 = vpop.eup %271  ;;  %283 = vtanh.f32 %v139_v38 }
  0xa2   :  { %v161_v34 = vsel %vm160_vm1, %v152_v31, 0.0  ;;  %v274_v35 = vpop.eup %273  ;;  %v154_v36 = vmul.f32 %v272_v33, %v268_v26 }
  0xa3   :  { %162 = vadd.xlane.f32.xlu0 %v161_v34  ;;  %v276_v37 = vpop.eup %275  ;;  %v153_v43 = vmul.f32 %v274_v35, %v268_v26 }
  0xa4   :  { %v278_v39 = vpop.eup %277  ;;  %v156_v40 = vmul.f32 %v276_v37, %v268_v26  ;;  %v167_v41 = vsel %vm160_vm1, %v154_v36, 0.0 }
  0xa5   :  { %v280_v42 = vpop.eup %279  ;;  %168 = vadd.xlane.f32.xlu1 %v167_v41  ;;  %v155_v46 = vmul.f32 %v278_v39, %v268_v26  ;;  %v164_v47 = vsel %vm160_vm1, %v153_v43, 0.0 }
  0xa6   :  { %v173_v44 = vsel %vm160_vm1, %v156_v40, 0.0  ;;  %v157_v45 = vmul.f32 %v280_v42, %v268_v26  ;;  %v282_v48 = vpop.eup %281 }
  0xa7   :  { %174 = vadd.xlane.f32.xlu2 %v173_v44  ;;  %v170_v50 = vsel %vm160_vm1, %v155_v46, 0.0  ;;  %v284_v51 = vpop.eup %283  ;;  %v158_v52 = vmul.f32 %v282_v48, %v268_v26 }
  0xa8   :  { %v176_v49 = vsel %vm160_vm1, %v157_v45, 0.0  ;;  %v159_v53 = vmul.f32 %v284_v51, %v268_v26 }
  0xa9   :  { %v179_v54 = vsel %vm160_vm1, %v158_v52, 0.0 }
  0xaa   :  { %v182_v55 = vsel %vm160_vm1, %v159_v53, 0.0 }
  0xab   :  { %165 = vadd.xlane.f32.xlu0 %v164_v47 }
  0xad   :  { %171 = vadd.xlane.f32.xlu1 %v170_v50 }
  0xaf   :  { %177 = vadd.xlane.f32.xlu2 %v176_v49 }
  0xb3   :  { %180 = vadd.xlane.f32.xlu0 %v179_v54 }
  0xb5   :  { %183 = vadd.xlane.f32.xlu1 %v182_v55 }
 0x116   :  { %v163_v56 = vpop.xlane.xlu0 %162 }
 0x117   :  { %v196_v62 = vperm.slane %v163_v56, %v195_v59 }
 0x118   :  { %v169_v58 = vpop.xlane.xlu1 %168 }
 0x119   :  { %v198_v0 = vperm.slane %v169_v58, %v195_v59 }
 0x11a   :  { %v175_v60 = vpop.xlane.xlu2 %174 }
 0x11b   :  { %v200_v5 = vperm.slane %v175_v60, %v195_v59 }
 0x11e   :  { %v166_v61 = vpop.xlane.xlu0 %165 }
 0x11f   :  { %v197_v63 = vperm.slane %v166_v61, %v195_v59 }
 0x120   :  { %v172_v2 = vpop.xlane.xlu1 %171 }
 0x121   :  { %v205_v1 = vsel %vm204_vm2, %v197_v63, %v196_v62  ;;  %v199_v3 = vperm.slane %v172_v2, %v195_v59 }
 0x122   :  { %v207_v4 = vsel %vm206_vm3, %v198_v0, %v205_v1  ;;  %v178_v6 = vpop.xlane.xlu2 %177 }
 0x123   :  { %v209_v7 = vsel %vm208_vm4, %v199_v3, %v207_v4  ;;  %v201_v9 = vperm.slane %v178_v6, %v195_v59 }
 0x124   :  { %v211_v8 = vsel %vm210_vm5, %v200_v5, %v209_v7 }
 0x125   :  { %v213_v12 = vsel %vm212_vm6, %v201_v9, %v211_v8 }
 0x126   :  { %v181_v10 = vpop.xlane.xlu0 %180 }
 0x127   :  { %v202_v11 = vperm.slane %v181_v10, %v195_v59 }
 0x128   :  { %v184_v14 = vpop.xlane.xlu1 %183 }
 0x129   :  { %v215_v13 = vsel %vm214_vm7, %v202_v11, %v213_v12  ;;  %v203_v15 = vperm.slane %v184_v14, %v195_v59 }
 0x12b   :  { %v217_v16 = vsel %vm216_vm8, %v203_v15, %v215_v13 }
 0x12c   :  { %221 = vst.msk [vmem:[%s418_s5] sm:$0xff] %vm220_vm9, %v217_v16 }
 0x133   :  { %v228_v18 = vld [vmem:[%s418_s5] sm:$0xff] }
 0x134   :  { %v229_v19 = vsel %vm227_vm10, %v228_v18, -1e+18 }
 0x135   :  { %v230_v20 = vsel %vm220_vm9, %v229_v19, -inf }
 0x136   :  { %v231_v21 = vrot.slane %v230_v20, 4 }
 0x138   :  { %v232_v22 = vmax.f32 %v230_v20, %v231_v21 }
 0x13a   :  { %v233_v23 = vrot.slane %v232_v22, 2 }
 0x13c   :  { %v234_v24 = vmax.f32 %v232_v22, %v233_v23 }
 0x13e   :  { %v235_v25 = vrot.slane %v234_v24, 1 }
 0x140   :  { %v236_v26 = vmax.f32 %v234_v24, %v235_v25 }
 0x142   :  { %v237_v27 = vsub.f32 %v229_v19, %v236_v26 }
 0x144   :  { %v238_v28 = vmul.f32 1.442695, %v237_v27 }
 0x146   :  { %285 = vpow2.f32 %v238_v28 }
 0x14c   :  { %v286_v29 = vpop.eup %285 }
 0x14d   :  { %v240_v30 = vsel %vm220_vm9, %v286_v29, 0.0 }
 0x14e   :  { %v241_v31 = vrot.slane %v240_v30, 4 }
 0x150   :  { %v242_v32 = vadd.f32 %v241_v31, %v240_v30 }
 0x152   :  { %v243_v33 = vrot.slane %v242_v32, 2 }
 0x154   :  { %v244_v34 = vadd.f32 %v243_v33, %v242_v32 }
 0x156   :  { %v245_v35 = vrot.slane %v244_v34, 1 }
 0x158   :  { %v246_v36 = vadd.f32 %v245_v35, %v244_v34 }
 0x15a   :  { %287 = vrcp.f32 %v246_v36 }
 0x160   :  { %v288_v37 = vpop.eup %287 }
 0x161   :  { %v248_v38 = vmul.f32 %v288_v37, %v286_v29 }
 0x163   :  { %249 = vst.msk [vmem:[%s418_s5] sm:$0xff] %vm220_vm9, %v248_v38 }
 0x164   :  { %254 = vsyncpa [#allocation3], 1 }
 0x165   :  { %255 = vsyncpa [#allocation5], 1 }

</bundles_post_ra>
